<compile_context>
chip_gen: v6e
topology: v6e:2x2x1
jax: 0.10.0
libtpu: 0.0.40
codegen_flags: <defaults>
</compile_context>

<pallas_src>
import jax
import jax.numpy as jnp
from jax.experimental import pallas as pl
from jax.experimental.pallas import tpu as pltpu

_LANE_WIDTHS = (4096, 2048, 1024, 512, 256, 128)
_TARGET_BLOCK_ELEMS = 1 << 20    # ~4 MiB of f32 per input block
_VMEM_LIMIT_BYTES = 48 << 20     # fits v7x (64 MiB physical), lifts v5e's 16 MiB default


def _tensorcore_count():
    """TensorCores per chip (2 on v7x, 1 on v5e/v6e); conservative fallback 1."""
    try:
        info = pltpu.get_tpu_info()
    except Exception:
        return 1
    for name in ("num_cores", "core_count", "num_tensorcores",
                 "tensorcore_count", "num_cores_per_chip"):
        v = getattr(info, name, None)
        if isinstance(v, int) and 1 <= v <= 8:
            return v
    return 1


def _make_kernel(block_rows, spc, rows, num_blocks, needs_mask):
    def kernel(p_ref, t_ref, out_ref, acc_ref):
        c = pl.program_id(0)
        i = pl.program_id(1)

        @pl.when(i == 0)
        def _():
            acc_ref[...] = jnp.zeros_like(acc_ref)

        p = p_ref[...].astype(jnp.float32)
        t = t_ref[...].astype(jnp.float32)

        # PyTorch BCELoss clamps each log term at -100 before combining.
        log_p = jnp.maximum(jnp.log(p), -100.0)
        log_1mp = jnp.maximum(jnp.log1p(-p), -100.0)
        # Folded: t*log_p + (1-t)*log_1mp == t*(log_p - log_1mp) + log_1mp.
        # The single negation happens once per slice in the finalize.
        term = t * (log_p - log_1mp) + log_1mp

        def accumulate(x):
            # Sublane partial reduce rides the otherwise-idle XLU slot; the
            # accumulator stays a single (1, lane_w) row in VMEM.
            acc_ref[...] += jnp.sum(x, axis=0, keepdims=True)

        if needs_mask:
            blk = c * spc + i
            is_tail = blk >= num_blocks - 1

            @pl.when(is_tail)
            def _():
                # Mask rows past the logical end (partial last block and any
                # clamped duplicate block).  Must remain a select: masked rows
                # can hold NaN/Inf from the logs above.
                row0 = blk * block_rows
                row_ids = jax.lax.broadcasted_iota(jnp.int32, term.shape, 0) + row0
                accumulate(jnp.where(row_ids < rows, term, 0.0))

            @pl.when(jnp.logical_not(is_tail))
            def _():
                accumulate(term)
        else:
            accumulate(term)

        @pl.when(i == spc - 1)
        def _():
            # One small cross-lane reduce + one negate per slice.
            out_ref[0, 0] = -jnp.sum(acc_ref[...])

    return kernel


def _bce_sum_flat(p_flat, t_flat):
    """Pallas sum of clamped BCE terms over a flat vector whose length is a
    multiple of 128.  Returns an f32 scalar (the un-normalized sum)."""
    n = p_flat.size
    lane_w = next(c for c in _LANE_WIDTHS if n % c == 0)
    rows = n // lane_w
    p2 = p_flat.reshape(rows, lane_w)
    t2 = t_flat.reshape(rows, lane_w)

    # ~4 MiB of f32 per input block; sublane count a multiple of 32 (covers
    # bf16 packing) unless the whole array fits in a single block.
    target_rows = max(8, _TARGET_BLOCK_ELEMS // lane_w)
    if rows <= target_rows:
        block_rows = rows
    else:
        block_rows = max(32, (target_rows // 32) * 32)

    num_blocks = pl.cdiv(rows, block_rows)
    n_outer = min(_tensorcore_count(), num_blocks)   # per-TC partial sums
    spc = pl.cdiv(num_blocks, n_outer)               # inner (reduction) steps

    needs_clamp = n_outer * spc > num_blocks
    needs_mask = n_outer * spc * block_rows != rows

    if needs_clamp:
        in_idx = lambda c, i: (jnp.minimum(c * spc + i, num_blocks - 1), 0)
    else:
        in_idx = lambda c, i: (c * spc + i, 0)

    # TODO(synk): if a v7x trace shows only one TC active with plain
    # "parallel" semantics, switch the outer axis to pltpu.CORE_PARALLEL.
    partials = pl.pallas_call(
        _make_kernel(block_rows, spc, rows, num_blocks, needs_mask),
        out_shape=jax.ShapeDtypeStruct((n_outer, 1), jnp.float32),
        grid=(n_outer, spc),
        in_specs=[
            pl.BlockSpec((block_rows, lane_w), in_idx),
            pl.BlockSpec((block_rows, lane_w), in_idx),
        ],
        out_specs=pl.BlockSpec(
            (1, 1), lambda c, i: (c, 0), memory_space=pltpu.MemorySpace.SMEM
        ),
        scratch_shapes=[pltpu.VMEM((1, lane_w), jnp.float32)],
        compiler_params=pltpu.CompilerParams(
            dimension_semantics=("parallel", "arbitrary"),
            vmem_limit_bytes=_VMEM_LIMIT_BYTES,
        ),
        cost_estimate=pl.CostEstimate(
            flops=5 * n,
            transcendentals=2 * n,
            bytes_accessed=p2.size * p2.dtype.itemsize
            + t2.size * t2.dtype.itemsize
            + 4 * n_outer,
        ),
    )(p2, t2)

    return jnp.sum(partials)  # tiny (<= #TC element) final reduce in XLA


def _bce_sum_xla(p, t):
    """Plain-XLA clamped-BCE sum for the rare <128-element remainder."""
    p = p.astype(jnp.float32)
    t = t.astype(jnp.float32)
    log_p = jnp.maximum(jnp.log(p), -100.0)
    log_1mp = jnp.maximum(jnp.log1p(-p), -100.0)
    return jnp.sum(-(t * log_p + (1.0 - t) * log_1mp))


def bce_loss(logit, target):
    """Mean BCE between probabilities `logit` (N,1,H,W) and `target` (N,H,W),
    matching nn.BCELoss(reduction='mean')(logit, target.unsqueeze(1))."""
    t = target[:, None, ...]  # unsqueeze(1), matches the PyTorch module
    assert logit.shape == t.shape, (logit.shape, t.shape)

    n = logit.size
    p_flat = logit.reshape(-1)  # free reshape on contiguous NCHW
    t_flat = t.reshape(-1)      # keep native dtype; cast to f32 inside the kernel

    main_n = (n // 128) * 128
    total = jnp.float32(0.0)
    if main_n > 0:
        total = total + _bce_sum_flat(p_flat[:main_n], t_flat[:main_n])
    if main_n < n:
        # Sub-128 remainder handled in XLA instead of padding both inputs
        # (avoids a full extra HBM copy on this bandwidth-bound path).
        total = total + _bce_sum_xla(p_flat[main_n:], t_flat[main_n:])

    return (total / jnp.float32(n)).astype(logit.dtype)


def _bce_ref(logit, target):
    t = target[:, None, ...].astype(jnp.float32)
    p = logit.astype(jnp.float32)
    log_p = jnp.maximum(jnp.log(p), -100.0)
    log_1mp = jnp.maximum(jnp.log1p(-p), -100.0)
    return jnp.mean(-(t * log_p + (1.0 - t) * log_1mp))


if __name__ == "__main__":
    key = jax.random.PRNGKey(0)
    k1, k2 = jax.random.split(key)

    N, C, H, W = 2, 1, 16, 16  # logit channel dim 1 to match unsqueezed target
    logit = jax.nn.sigmoid(jax.random.normal(k1, (N, C, H, W), dtype=jnp.float32))
    target = (jax.random.uniform(k2, (N, H, W)) > 0.5).astype(jnp.float32)

    loss = bce_loss(logit, target)
    jax.block_until_ready(loss)

    ref = _bce_ref(logit, target)
    assert jnp.allclose(loss, ref, rtol=1e-5, atol=1e-6), (loss, ref)

    print("KERNEL_OK")
</pallas_src>

<mosaic_0001>
module attributes {stable_mosaic.version = 11 : i64} {
  func.func @kernel(%arg0: i32, %arg1: i32, %arg2: memref<1x512xf32, #tpu.memory_space<vmem>>, %arg3: memref<1x512xf32, #tpu.memory_space<vmem>>, %arg4: memref<1x1xf32, #tpu.memory_space<smem>>, %arg5: memref<1x512xf32, #tpu.memory_space<vmem>>) attributes {dimension_semantics = [#tpu.dimension_semantics<parallel>, #tpu.dimension_semantics<arbitrary>], iteration_bounds = array<i64: 1, 1>, scalar_prefetch = 0 : i64, scratch_operands = 1 : i64, tpu.core_type = #tpu.core_type<tc>, window_params = [{transform_indices = @transform_0, window_bounds = array<i64: 1, 512>}, {transform_indices = @transform_1, window_bounds = array<i64: 1, 512>}, {transform_indices = @transform_2, window_bounds = array<i64: 1, 1>}]} {
    %c0_i32 = arith.constant 0 : i32
    %0 = arith.cmpi eq, %arg1, %c0_i32 : i32
    %1 = arith.extui %0 : i1 to i32
    %c0_i32_0 = arith.constant 0 : i32
    %2 = arith.cmpi ne, %1, %c0_i32_0 : i32
    scf.if %2 {
      %cst_13 = arith.constant 0.000000e+00 : f32
      %24 = vector.broadcast %cst_13 : f32 to vector<1x512xf32>
      %c0_14 = arith.constant 0 : index
      %c0_15 = arith.constant 0 : index
      %25 = vector.load %arg5[%c0_14, %c0_15] : memref<1x512xf32, #tpu.memory_space<vmem>>, vector<1x512xf32>
      tpu.vector_store %arg5[%c0_14, %c0_15], %24 {strides = array<i32>} : memref<1x512xf32, #tpu.memory_space<vmem>>, vector<1x512xf32>,
    } else {
    }
    %c0 = arith.constant 0 : index
    %c0_1 = arith.constant 0 : index
    %3 = vector.load %arg2[%c0, %c0_1] : memref<1x512xf32, #tpu.memory_space<vmem>>, vector<1x512xf32>
    %c0_2 = arith.constant 0 : index
    %c0_3 = arith.constant 0 : index
    %4 = vector.load %arg3[%c0_2, %c0_3] : memref<1x512xf32, #tpu.memory_space<vmem>>, vector<1x512xf32>
    %5 = math.log %3 : vector<1x512xf32>
    %cst = arith.constant -1.000000e+02 : f32
    %6 = vector.broadcast %cst : f32 to vector<1x512xf32>
    %7 = arith.maximumf %5, %6 : vector<1x512xf32>
    %cst_4 = arith.constant 0.000000e+00 : f32
    %8 = vector.broadcast %cst_4 : f32 to vector<1x512xf32>
    %9 = arith.subf %8, %3 : vector<1x512xf32>
    %10 = math.log1p %9 : vector<1x512xf32>
    %cst_5 = arith.constant -1.000000e+02 : f32
    %11 = vector.broadcast %cst_5 : f32 to vector<1x512xf32>
    %12 = arith.maximumf %10, %11 : vector<1x512xf32>
    %13 = arith.subf %7, %12 : vector<1x512xf32>
    %14 = arith.mulf %4, %13 : vector<1x512xf32>
    %15 = arith.addf %14, %12 : vector<1x512xf32>
    %c0_6 = arith.constant 0 : index
    %c0_7 = arith.constant 0 : index
    %16 = vector.load %arg5[%c0_6, %c0_7] : memref<1x512xf32, #tpu.memory_space<vmem>>, vector<1x512xf32>
    %cst_8 = arith.constant dense<0.000000e+00> : vector<512xf32>
    %17 = vector.multi_reduction <add>, %15, %cst_8 [0] : vector<1x512xf32> to vector<512xf32>
    %18 = vector.shape_cast %17 : vector<512xf32> to vector<1x512xf32>
    %19 = arith.addf %16, %18 : vector<1x512xf32>
    %c0_9 = arith.constant 0 : index
    %c0_10 = arith.constant 0 : index
    %20 = vector.load %arg5[%c0_9, %c0_10] : memref<1x512xf32, #tpu.memory_space<vmem>>, vector<1x512xf32>
    tpu.vector_store %arg5[%c0_9, %c0_10], %19 {strides = array<i32>} : memref<1x512xf32, #tpu.memory_space<vmem>>, vector<1x512xf32>,
    %c0_i32_11 = arith.constant 0 : i32
    %21 = arith.cmpi eq, %arg1, %c0_i32_11 : i32
    %22 = arith.extui %21 : i1 to i32
    %c0_i32_12 = arith.constant 0 : i32
    %23 = arith.cmpi ne, %22, %c0_i32_12 : i32
    scf.if %23 {
      %c0_13 = arith.constant 0 : index
      %c0_14 = arith.constant 0 : index
      %24 = vector.load %arg5[%c0_13, %c0_14] : memref<1x512xf32, #tpu.memory_space<vmem>>, vector<1x512xf32>
      %25 = vector.shape_cast %24 : vector<1x512xf32> to vector<1x1x512xf32>
      %cst_15 = arith.constant dense<0.000000e+00> : vector<1xf32>
      %26 = vector.multi_reduction <add>, %25, %cst_15 [1, 2] : vector<1x1x512xf32> to vector<1xf32>
      %27 = vector.shape_cast %26 : vector<1xf32> to vector<1x1x1xf32>
      %28 = vector.extract %27[0, 0, 0] : f32 from vector<1x1x1xf32>
      %cst_16 = arith.constant 0.000000e+00 : f32
      %29 = arith.subf %cst_16, %28 : f32
      %c0_17 = arith.constant 0 : index
      %c0_18 = arith.constant 0 : index
      %30 = memref.load %arg4[%c0_17, %c0_18] : memref<1x1xf32, #tpu.memory_space<smem>>
      memref.store %29, %arg4[%c0_17, %c0_18] : memref<1x1xf32, #tpu.memory_space<smem>>
    } else {
    }
    return
  }
  func.func @transform_0(%arg0: i32, %arg1: i32) -> (i32, i32) {
    %c1_i32 = arith.constant 1 : i32
    %0 = arith.muli %arg0, %c1_i32 : i32
    %1 = arith.addi %0, %arg1 : i32
    %c0_i32 = arith.constant 0 : i32
    %c0_i32_0 = arith.constant 0 : i32
    return %1, %c0_i32 : i32, i32
  }
  func.func @transform_1(%arg0: i32, %arg1: i32) -> (i32, i32) {
    %c1_i32 = arith.constant 1 : i32
    %0 = arith.muli %arg0, %c1_i32 : i32
    %1 = arith.addi %0, %arg1 : i32
    %c0_i32 = arith.constant 0 : i32
    %c0_i32_0 = arith.constant 0 : i32
    return %1, %c0_i32 : i32, i32
  }
  func.func @transform_2(%arg0: i32, %arg1: i32) -> (i32, i32) {
    %c0_i32 = arith.constant 0 : i32
    %c0_i32_0 = arith.constant 0 : i32
    return %arg0, %c0_i32 : i32, i32
  }
}

</mosaic_0001>

<bundles_post_ra>
// kernel: tpu_custom_call.1
= control target key start
LH: loop header
LB: loop body
LE: loop exit
PB: predicated region body
PF: predicated region fallthrough
CT: control target
= control target key end

     0   :  { %7 = vsyncpa [#allocation4], 0  ;;  %s242_s0 = inlined_call_operand.hbm [shape: f32[1,512], index: 0, kind: input, shape index: {}]   ;;  %s243_s1 = inlined_call_operand.hbm [shape: f32[1,512], index: 1, kind: input, shape index: {}]   ;;  %s244_s2 = inlined_call_operand.hbm [shape: f32[1,1], index: 2, kind: output, shape index: {}]  }
   0x1   :  { %8 = vsyncpa [#allocation7], 0 }
   0x2   :  { %9 = vsyncpa [#allocation5], 0  ;;  %s206_s9 = smov [#allocation3]   ;;  %s207_s11 = smov [#allocation6]  }
   0x3   :  { %s20_s10 = sshll.u32 %s206_s9, 4  ;;  %s34_s12 = sshll.u32 %s207_s11, 4  ;;  %s21_s10 = int_to_ptr.vmem [resolvable:$true] %s20_s10  ;;  %s35_s12 = int_to_ptr.vmem [resolvable:$true] %s34_s12 }
   0x4   :  { %s160_s13 = scalar_lea.vmem %s21_s10, 64  ;;  %p165_p1 = scmp.lt.s32.totalorder %s21_s10, %s21_s10 }
   0x5   :  { %p161_p0 = scmp.ne.s32.totalorder %s21_s10, %s160_s13  ;;  %p166_p2 = scmp.lt.s32.totalorder %s160_s13, %s160_s13 }
   0x7   :  { %p167_p3 = por %p166_p2, %p165_p1 }
   0x9   :  { %p168_p4 = pnand %p167_p3, %p161_p0 }
   0xb   :  { %171 = shalt.err (!%p168_p4)
}
   0xc   :  { %23 = dma.hbm_to_vmem [thread:$0]  %s242_s0, 64, %s21_s10, [#allocation4]  }
   0xd   :  { %s180_s16 = scalar_lea.vmem %s35_s12, 64  ;;  %p185_p6 = scmp.lt.s32.totalorder %s35_s12, %s35_s12 }
   0xe   :  { %p181_p5 = scmp.ne.s32.totalorder %s35_s12, %s180_s16  ;;  %p186_p7 = scmp.lt.s32.totalorder %s180_s16, %s180_s16 }
  0x10   :  { %p187_p8 = por %p186_p7, %p185_p6 }
  0x12   :  { %p188_p9 = pnand %p187_p8, %p181_p5 }
  0x14   :  { %191 = shalt.err (!%p188_p9)
}
  0x15   :  { %37 = dma.hbm_to_vmem [thread:$0]  %s243_s1, 64, %s35_s12, [#allocation7]  }
  0x16   :  { %200 = dma.done.wait [#allocation4], 64  }
  0x17   :  { %201 = vsyncadd [#allocation4], 4294967232 }
  0x18   :  { %202 = dma.done.wait [#allocation7], 64  }
  0x19   :  { %203 = vsyncadd [#allocation7], 4294967232  ;;  %v50_v0 = vlaneseq  ;;  %v208_v2 = vmov 0.0   ;;  %v55_v3 = vld [vmem:[#allocation3] sm:$0xf]  ;;  %vm107_vm2 = vcmask 1040384  }
  0x1a   :  { %148 = vlog2.f32 %v55_v3  ;;  %v60_v4 = vsub.f32 0.0, %v55_v3  ;;  %v56_v17 = vld [vmem:[#allocation6] sm:$0xf]  ;;  %s209_s19 = smov [#allocation8]  }
  0x1b   :  { %vm231_vm0 = vcmp.lt.s32.totalorder %v50_v0, 512  ;;  %v88_v23 = vshrl.u32 %v50_v0, 7 }
  0x1c   :  { %54 = vst.msk [vmem:[#allocation2] sm:$0xf] %vm231_vm0, %v208_v2  ;;  %v61_v5 = vadd.f32 1.0, %v60_v4  ;;  %v64_v6 = vmul.f32 -0.5, %v60_v4  ;;  %v67_v9 = vand.u32 2147483647, %v60_v4 }
  0x1d   :  { %v89_v24 = vsub.s32 0, %v88_v23  ;;  %v93_v25 = vsub.s32 1, %v88_v23  ;;  %v97_v26 = vsub.s32 2, %v88_v23  ;;  %v101_v27 = vsub.s32 3, %v88_v23 }
  0x1e   :  { %150 = vlog2.f32 %v61_v5  ;;  %v65_v7 = vadd.f32 1.0, %v64_v6  ;;  %vm68_vm1 = vcmp.lt.f32.partialorder %v67_v9, 0.0004427343 }
  0x20   :  { %v66_v11 = vmul.f32 %v65_v7, %v60_v4 }
  0x23   :  { %v74_v20 = vld [vmem:[#allocation2] sm:$0xf] }
  0x27   :  { %v149_v8 = vpop.eup %148 }
  0x28   :  { %v58_v10 = vmul.f32 0.6931472, %v149_v8 }
  0x2a   :  { %v59_v14 = vmax.f32 %v58_v10, -100.0 }
  0x2b   :  { %v151_v12 = vpop.eup %150 }
  0x2c   :  { %v63_v13 = vmul.f32 0.6931472, %v151_v12 }
  0x2e   :  { %v69_v15 = vsel %vm68_vm1, %v66_v11, %v63_v13 }
  0x2f   :  { %v70_v16 = vmax.f32 %v69_v15, -100.0 }
  0x31   :  { %v71_v18 = vsub.f32 %v59_v14, %v70_v16 }
  0x33   :  { %v72_v19 = vmul.f32 %v71_v18, %v56_v17 }
  0x35   :  { %v73_v21 = vadd.f32 %v72_v19, %v70_v16 }
  0x37   :  { %v76_v22 = vadd.f32 %v74_v20, %v73_v21 }
  0x39   :  { %81 = vst.msk [vmem:[#allocation2] sm:$0xf] %vm231_vm0, %v76_v22 }
  0x40   :  { %v85_v28 = vld [vmem:[#allocation2] sm:$0xf] }
  0x41   :  { %v90_v29 = vrot.slane %v85_v28, %v89_v24  ;;  %v94_v30 = vrot.slane %v85_v28, %v93_v25  ;;  %v98_v31 = vrot.slane %v85_v28, %v97_v26  ;;  %v102_v32 = vrot.slane %v85_v28, %v101_v27 }
  0x43   :  { %v108_v33 = vsel %vm107_vm2, %v90_v29, 0.0  ;;  %v109_v34 = vsel %vm107_vm2, %v94_v30, 0.0  ;;  %v111_v35 = vsel %vm107_vm2, %v98_v31, 0.0  ;;  %v113_v37 = vsel %vm107_vm2, %v102_v32, 0.0 }
  0x44   :  { %v110_v36 = vadd.f32 %v109_v34, %v108_v33 }
  0x46   :  { %v112_v38 = vadd.f32 %v111_v35, %v110_v36 }
  0x48   :  { %v114_v39 = vadd.f32 %v113_v37, %v112_v38 }
  0x4a   :  { %115 = vadd.xlane.f32.xlu0 %v114_v39 }
  0xd3   :  { %v116_v40 = vpop.xlane.xlu0 %115 }
  0xd4   :  { %v117_v41 = vrot.slane %v116_v40, 4 }
  0xd6   :  { %v118_v42 = vadd.f32 %v117_v41, %v116_v40 }
  0xd8   :  { %v119_v43 = vrot.slane %v118_v42, 2 }
  0xda   :  { %v120_v44 = vadd.f32 %v119_v43, %v118_v42 }
  0xdc   :  { %v121_v45 = vrot.slane %v120_v44, 1 }
  0xde   :  { %v122_v46 = vadd.f32 %v121_v45, %v120_v44 }
  0xe0   :  { %142 = vpush %v122_v46 }
 0x111   :  { %s143_s0 = spop %142 }
 0x112   :  { %s124_s1 = ssub.f32 0.0, %s143_s0 }
 0x114   :  { %126 = sst [smem:[#allocation8]] %s124_s1 }
 0x115   :  { %134 = dma.smem_to_hbm %s209_s19, 16, %s244_s2, [#allocation5]  }
 0x116   :  { %204 = dma.done.wait [#allocation5], 16  }
 0x117   :  { %205 = vsyncadd [#allocation5], 4294967280 }
 0x118   :  { %138 = sfence }
 0x119   :  { %139 = vsyncpa [#allocation4], 1 }
 0x11a   :  { %140 = vsyncpa [#allocation7], 1 }
 0x11b   :  { %141 = vsyncpa [#allocation5], 1 }

</bundles_post_ra>
